<compile_context>
chip_gen: v7x
topology: tpu7x:2x2x1
jax: 0.10.0
libtpu: 0.0.40
codegen_flags: <defaults>
</compile_context>

<pallas_src>
import jax
import jax.numpy as jnp
import numpy as np
from jax.experimental import pallas as pl
from jax.experimental.pallas import tpu as pltpu

_LANE = 128


def _round_up(n, m):
    return ((n + m - 1) // m) * m


def lstm_kernel(x_ref, wih_ref, whh_ref, b_ref, wlin_ref, blin_ref, out_ref):
    """Full LSTM recurrence + linear head for one sequence.

    x_ref    : (T, F)       input sequence
    wih_ref  : (F, 4*Hp)    input->gates weight, gate blocks 128-lane aligned
    whh_ref  : (H, 4*Hp)    hidden->gates weight (contraction dim kept at H)
    b_ref    : (1, 4*Hp)    combined bias (b_ih + b_hh), same column layout
    wlin_ref : (H, Cp)      linear weight, lane-padded to Cp (multiple of 128)
    blin_ref : (1, Cp)      linear bias, lane-padded
    out_ref  : (1, Cp)      output logits (lane-padded)
    """
    T = x_ref.shape[0]
    H = whh_ref.shape[0]
    Hp = whh_ref.shape[1] // 4  # lane-aligned gate block width (>= 128)

    # Hoisted input projection + bias: one (T,F)@(F,4Hp) matmul, done once,
    # entirely off the recurrent critical path.
    xg = (jnp.dot(x_ref[...], wih_ref[...], preferred_element_type=jnp.float32)
          + b_ref[...])                                   # (T, 4*Hp)

    # (H, 4*Hp) f32 = 64 KiB -> comfortably resident across the loop.
    whh = whh_ref[...]

    h = jnp.zeros((1, Hp), jnp.float32)
    c = jnp.zeros((1, Hp), jnp.float32)

    # T is static & tiny -> fully unrolled at trace time.  All gate slices
    # below start at multiples of Hp (>=128), so they are whole-vreg views:
    # the c/h update is pure full-width VPU math, no per-step lane rotates.
    # Pad lanes stay exactly zero every step (sigmoid(0)*0 terms).
    for t in range(T):
        # Only MXU op on the serial h->h chain; h[:, :H] is an offset-0
        # prefix slice (no realignment), keeping the RHS at K=H rows.
        gates = xg[t:t + 1, :] + jnp.dot(
            h[:, :H], whh, preferred_element_type=jnp.float32)   # (1, 4*Hp)

        i_g = jax.nn.sigmoid(gates[:, 0 * Hp:1 * Hp])
        f_g = jax.nn.sigmoid(gates[:, 1 * Hp:2 * Hp])
        g_g = jnp.tanh(gates[:, 2 * Hp:3 * Hp])
        o_g = jax.nn.sigmoid(gates[:, 3 * Hp:4 * Hp])

        c = f_g * c + i_g * g_g
        h = o_g * jnp.tanh(c)

    # Linear head on the last hidden state; Cp is a multiple of 128 so this
    # store is an unmasked lane-dense vst.
    out_ref[...] = (
        jnp.dot(h[:, :H], wlin_ref[...], preferred_element_type=jnp.float32)
        + blin_ref[...]
    )


def lstm_forward(x, params):
    """Pallas wrapper.  x: (T, F) float32 -> (C,) float32 (matches torch)."""
    wih_t, whh_t, bias, wlin_t, blin = params   # (F,4H) (H,4H) (1,4H) (H,C) (1,C)
    H = whh_t.shape[0]
    C = wlin_t.shape[1]
    Hp = max(_LANE, _round_up(H, _LANE))
    Cp = max(_LANE, _round_up(C, _LANE))

    # Re-lay gate columns on 128-lane-aligned blocks: padded block
    # [g*Hp, g*Hp+H) holds original gate-g columns [g*H, (g+1)*H); rest zero.
    def pad_gate_cols(w):
        wp = jnp.zeros((w.shape[0], 4 * Hp), jnp.float32)
        for g in range(4):
            wp = wp.at[:, g * Hp:g * Hp + H].set(w[:, g * H:(g + 1) * H])
        return wp

    wih_p = pad_gate_cols(wih_t)     # (F, 4*Hp)
    whh_p = pad_gate_cols(whh_t)     # (H, 4*Hp)
    bias_p = pad_gate_cols(bias)     # (1, 4*Hp)

    # Lane-pad the linear head so the final store is full-width & unmasked.
    wlin_p = jnp.zeros((H, Cp), jnp.float32).at[:, :C].set(wlin_t)
    blin_p = jnp.zeros((1, Cp), jnp.float32).at[:, :C].set(blin)

    vmem = pl.BlockSpec(memory_space=pltpu.MemorySpace.VMEM)
    out = pl.pallas_call(
        lstm_kernel,
        out_shape=jax.ShapeDtypeStruct((1, Cp), jnp.float32),
        in_specs=[vmem] * 6,
        out_specs=vmem,
    )(x, wih_p, whh_p, bias_p, wlin_p, blin_p)
    return out[0, :C]   # (C,), matches torch unbatched output


def init_params(key, n_features, hidden_size, n_classes):
    """Deterministic parameter init mimicking torch.nn.LSTM / Linear shapes."""
    k = 1.0 / np.sqrt(hidden_size)
    keys = jax.random.split(key, 6)
    # torch shapes: weight_ih (4H, F), weight_hh (4H, H), biases (4H,)
    w_ih = jax.random.uniform(keys[0], (4 * hidden_size, n_features), jnp.float32, -k, k)
    w_hh = jax.random.uniform(keys[1], (4 * hidden_size, hidden_size), jnp.float32, -k, k)
    b_ih = jax.random.uniform(keys[2], (4 * hidden_size,), jnp.float32, -k, k)
    b_hh = jax.random.uniform(keys[3], (4 * hidden_size,), jnp.float32, -k, k)
    # torch Linear: weight (C, H), bias (C,)
    w_lin = jax.random.uniform(keys[4], (n_classes, hidden_size), jnp.float32, -k, k)
    b_lin = jax.random.uniform(keys[5], (n_classes,), jnp.float32, -k, k)

    # Pre-transpose for right-multiplication; combine LSTM biases.
    return (
        w_ih.T,                              # (F, 4H)
        w_hh.T,                              # (H, 4H)
        (b_ih + b_hh)[None, :],              # (1, 4H)
        w_lin.T,                             # (H, C)
        b_lin[None, :],                      # (1, C)
    )


def lstm_forward_ref(x, params):
    """Pure-JAX reference for correctness checking."""
    wih_t, whh_t, bias, wlin_t, blin = params
    H = whh_t.shape[0]

    def step(carry, x_t):
        h, c = carry
        gates = x_t[None, :] @ wih_t + h @ whh_t + bias
        i_g = jax.nn.sigmoid(gates[:, 0:H])
        f_g = jax.nn.sigmoid(gates[:, H:2 * H])
        g_g = jnp.tanh(gates[:, 2 * H:3 * H])
        o_g = jax.nn.sigmoid(gates[:, 3 * H:4 * H])
        c_new = f_g * c + i_g * g_g
        h_new = o_g * jnp.tanh(c_new)
        return (h_new, c_new), None

    h0 = jnp.zeros((1, H), jnp.float32)
    c0 = jnp.zeros((1, H), jnp.float32)
    (h_last, _), _ = jax.lax.scan(step, (h0, c0), x)
    return (h_last @ wlin_t + blin)[0]


if __name__ == "__main__":
    # Small shapes consistent with the module: seq=8, n_features=4,
    # hidden_size=32, n_classes=4.
    T, F, H, C = 8, 4, 32, 4

    key = jax.random.PRNGKey(0)
    k_x, k_p = jax.random.split(key)
    x = jax.random.normal(k_x, (T, F), jnp.float32)
    params = init_params(k_p, F, H, C)

    out = jax.block_until_ready(lstm_forward(x, params))
    ref = jax.block_until_ready(lstm_forward_ref(x, params))

    assert out.shape == (C,)
    np.testing.assert_allclose(np.asarray(out), np.asarray(ref), rtol=1e-5, atol=1e-5)

    print("KERNEL_OK")
</pallas_src>

<mosaic_0001>
module attributes {stable_mosaic.version = 11 : i64} {
  func.func @lstm_kernel(%arg0: memref<8x4xf32, #tpu.memory_space<vmem>>, %arg1: memref<4x512xf32, #tpu.memory_space<vmem>>, %arg2: memref<32x512xf32, #tpu.memory_space<vmem>>, %arg3: memref<1x512xf32, #tpu.memory_space<vmem>>, %arg4: memref<32x128xf32, #tpu.memory_space<vmem>>, %arg5: memref<1x128xf32, #tpu.memory_space<vmem>>, %arg6: memref<1x128xf32, #tpu.memory_space<vmem>>) attributes {dimension_semantics = [], scalar_prefetch = 0 : i64, scratch_operands = 0 : i64, tpu.core_type = #tpu.core_type<tc>} {
    %c0 = arith.constant 0 : index
    %c0_0 = arith.constant 0 : index
    %0 = vector.load %arg0[%c0, %c0_0] : memref<8x4xf32, #tpu.memory_space<vmem>>, vector<8x4xf32>
    %c0_1 = arith.constant 0 : index
    %c0_2 = arith.constant 0 : index
    %1 = vector.load %arg1[%c0_1, %c0_2] : memref<4x512xf32, #tpu.memory_space<vmem>>, vector<4x512xf32>
    %cst = arith.constant dense<0.000000e+00> : vector<8x512xf32>
    %2 = tpu.matmul %0, %1, %cst {dimension_numbers = #tpu.dot_dimension_numbers<[1], [0], [0], [1], [0, 0, 1, 1], [], []>} : vector<8x4xf32>, vector<4x512xf32>, vector<8x512xf32> -> vector<8x512xf32>
    %c0_3 = arith.constant 0 : index
    %c0_4 = arith.constant 0 : index
    %3 = vector.load %arg3[%c0_3, %c0_4] : memref<1x512xf32, #tpu.memory_space<vmem>>, vector<1x512xf32>
    %4 = vector.broadcast %3 : vector<1x512xf32> to vector<8x512xf32>
    %5 = arith.addf %2, %4 : vector<8x512xf32>
    %c0_5 = arith.constant 0 : index
    %c0_6 = arith.constant 0 : index
    %6 = vector.load %arg2[%c0_5, %c0_6] : memref<32x512xf32, #tpu.memory_space<vmem>>, vector<32x512xf32>
    %cst_7 = arith.constant 0.000000e+00 : f32
    %7 = vector.broadcast %cst_7 : f32 to vector<1x128xf32>
    %cst_8 = arith.constant 0.000000e+00 : f32
    %8 = vector.broadcast %cst_8 : f32 to vector<1x128xf32>
    %9 = vector.extract_strided_slice %5 {offsets = [0, 0], sizes = [1, 512], strides = [1, 1]} : vector<8x512xf32> to vector<1x512xf32>
    %10 = vector.extract_strided_slice %7 {offsets = [0, 0], sizes = [1, 32], strides = [1, 1]} : vector<1x128xf32> to vector<1x32xf32>
    %cst_9 = arith.constant dense<0.000000e+00> : vector<1x512xf32>
    %11 = tpu.matmul %10, %6, %cst_9 {dimension_numbers = #tpu.dot_dimension_numbers<[1], [0], [0], [1], [0, 0, 1, 1], [], []>} : vector<1x32xf32>, vector<32x512xf32>, vector<1x512xf32> -> vector<1x512xf32>
    %12 = arith.addf %9, %11 : vector<1x512xf32>
    %13 = vector.extract_strided_slice %12 {offsets = [0, 0], sizes = [1, 128], strides = [1, 1]} : vector<1x512xf32> to vector<1x128xf32>
    %14 = arith.negf %13 : vector<1x128xf32>
    %15 = math.exp %14 : vector<1x128xf32>
    %cst_10 = arith.constant 1.000000e+00 : f32
    %16 = vector.broadcast %cst_10 : f32 to vector<1x128xf32>
    %17 = arith.addf %16, %15 : vector<1x128xf32>
    %18 = arith.divf %16, %17 : vector<1x128xf32>
    %19 = vector.extract_strided_slice %12 {offsets = [0, 128], sizes = [1, 128], strides = [1, 1]} : vector<1x512xf32> to vector<1x128xf32>
    %20 = arith.negf %19 : vector<1x128xf32>
    %21 = math.exp %20 : vector<1x128xf32>
    %cst_11 = arith.constant 1.000000e+00 : f32
    %22 = vector.broadcast %cst_11 : f32 to vector<1x128xf32>
    %23 = arith.addf %22, %21 : vector<1x128xf32>
    %24 = arith.divf %22, %23 : vector<1x128xf32>
    %25 = vector.extract_strided_slice %12 {offsets = [0, 256], sizes = [1, 128], strides = [1, 1]} : vector<1x512xf32> to vector<1x128xf32>
    %26 = math.tanh %25 : vector<1x128xf32>
    %27 = vector.extract_strided_slice %12 {offsets = [0, 384], sizes = [1, 128], strides = [1, 1]} : vector<1x512xf32> to vector<1x128xf32>
    %28 = arith.negf %27 : vector<1x128xf32>
    %29 = math.exp %28 : vector<1x128xf32>
    %cst_12 = arith.constant 1.000000e+00 : f32
    %30 = vector.broadcast %cst_12 : f32 to vector<1x128xf32>
    %31 = arith.addf %30, %29 : vector<1x128xf32>
    %32 = arith.divf %30, %31 : vector<1x128xf32>
    %33 = arith.mulf %24, %8 : vector<1x128xf32>
    %34 = arith.mulf %18, %26 : vector<1x128xf32>
    %35 = arith.addf %33, %34 : vector<1x128xf32>
    %36 = math.tanh %35 : vector<1x128xf32>
    %37 = arith.mulf %32, %36 : vector<1x128xf32>
    %38 = vector.extract_strided_slice %5 {offsets = [1, 0], sizes = [1, 512], strides = [1, 1]} : vector<8x512xf32> to vector<1x512xf32>
    %39 = vector.extract_strided_slice %37 {offsets = [0, 0], sizes = [1, 32], strides = [1, 1]} : vector<1x128xf32> to vector<1x32xf32>
    %cst_13 = arith.constant dense<0.000000e+00> : vector<1x512xf32>
    %40 = tpu.matmul %39, %6, %cst_13 {dimension_numbers = #tpu.dot_dimension_numbers<[1], [0], [0], [1], [0, 0, 1, 1], [], []>} : vector<1x32xf32>, vector<32x512xf32>, vector<1x512xf32> -> vector<1x512xf32>
    %41 = arith.addf %38, %40 : vector<1x512xf32>
    %42 = vector.extract_strided_slice %41 {offsets = [0, 0], sizes = [1, 128], strides = [1, 1]} : vector<1x512xf32> to vector<1x128xf32>
    %43 = arith.negf %42 : vector<1x128xf32>
    %44 = math.exp %43 : vector<1x128xf32>
    %cst_14 = arith.constant 1.000000e+00 : f32
    %45 = vector.broadcast %cst_14 : f32 to vector<1x128xf32>
    %46 = arith.addf %45, %44 : vector<1x128xf32>
    %47 = arith.divf %45, %46 : vector<1x128xf32>
    %48 = vector.extract_strided_slice %41 {offsets = [0, 128], sizes = [1, 128], strides = [1, 1]} : vector<1x512xf32> to vector<1x128xf32>
    %49 = arith.negf %48 : vector<1x128xf32>
    %50 = math.exp %49 : vector<1x128xf32>
    %cst_15 = arith.constant 1.000000e+00 : f32
    %51 = vector.broadcast %cst_15 : f32 to vector<1x128xf32>
    %52 = arith.addf %51, %50 : vector<1x128xf32>
    %53 = arith.divf %51, %52 : vector<1x128xf32>
    %54 = vector.extract_strided_slice %41 {offsets = [0, 256], sizes = [1, 128], strides = [1, 1]} : vector<1x512xf32> to vector<1x128xf32>
    %55 = math.tanh %54 : vector<1x128xf32>
    %56 = vector.extract_strided_slice %41 {offsets = [0, 384], sizes = [1, 128], strides = [1, 1]} : vector<1x512xf32> to vector<1x128xf32>
    %57 = arith.negf %56 : vector<1x128xf32>
    %58 = math.exp %57 : vector<1x128xf32>
    %cst_16 = arith.constant 1.000000e+00 : f32
    %59 = vector.broadcast %cst_16 : f32 to vector<1x128xf32>
    %60 = arith.addf %59, %58 : vector<1x128xf32>
    %61 = arith.divf %59, %60 : vector<1x128xf32>
    %62 = arith.mulf %53, %35 : vector<1x128xf32>
    %63 = arith.mulf %47, %55 : vector<1x128xf32>
    %64 = arith.addf %62, %63 : vector<1x128xf32>
    %65 = math.tanh %64 : vector<1x128xf32>
    %66 = arith.mulf %61, %65 : vector<1x128xf32>
    %67 = vector.extract_strided_slice %5 {offsets = [2, 0], sizes = [1, 512], strides = [1, 1]} : vector<8x512xf32> to vector<1x512xf32>
    %68 = vector.extract_strided_slice %66 {offsets = [0, 0], sizes = [1, 32], strides = [1, 1]} : vector<1x128xf32> to vector<1x32xf32>
    %cst_17 = arith.constant dense<0.000000e+00> : vector<1x512xf32>
    %69 = tpu.matmul %68, %6, %cst_17 {dimension_numbers = #tpu.dot_dimension_numbers<[1], [0], [0], [1], [0, 0, 1, 1], [], []>} : vector<1x32xf32>, vector<32x512xf32>, vector<1x512xf32> -> vector<1x512xf32>
    %70 = arith.addf %67, %69 : vector<1x512xf32>
    %71 = vector.extract_strided_slice %70 {offsets = [0, 0], sizes = [1, 128], strides = [1, 1]} : vector<1x512xf32> to vector<1x128xf32>
    %72 = arith.negf %71 : vector<1x128xf32>
    %73 = math.exp %72 : vector<1x128xf32>
    %cst_18 = arith.constant 1.000000e+00 : f32
    %74 = vector.broadcast %cst_18 : f32 to vector<1x128xf32>
    %75 = arith.addf %74, %73 : vector<1x128xf32>
    %76 = arith.divf %74, %75 : vector<1x128xf32>
    %77 = vector.extract_strided_slice %70 {offsets = [0, 128], sizes = [1, 128], strides = [1, 1]} : vector<1x512xf32> to vector<1x128xf32>
    %78 = arith.negf %77 : vector<1x128xf32>
    %79 = math.exp %78 : vector<1x128xf32>
    %cst_19 = arith.constant 1.000000e+00 : f32
    %80 = vector.broadcast %cst_19 : f32 to vector<1x128xf32>
    %81 = arith.addf %80, %79 : vector<1x128xf32>
    %82 = arith.divf %80, %81 : vector<1x128xf32>
    %83 = vector.extract_strided_slice %70 {offsets = [0, 256], sizes = [1, 128], strides = [1, 1]} : vector<1x512xf32> to vector<1x128xf32>
    %84 = math.tanh %83 : vector<1x128xf32>
    %85 = vector.extract_strided_slice %70 {offsets = [0, 384], sizes = [1, 128], strides = [1, 1]} : vector<1x512xf32> to vector<1x128xf32>
    %86 = arith.negf %85 : vector<1x128xf32>
    %87 = math.exp %86 : vector<1x128xf32>
    %cst_20 = arith.constant 1.000000e+00 : f32
    %88 = vector.broadcast %cst_20 : f32 to vector<1x128xf32>
    %89 = arith.addf %88, %87 : vector<1x128xf32>
    %90 = arith.divf %88, %89 : vector<1x128xf32>
    %91 = arith.mulf %82, %64 : vector<1x128xf32>
    %92 = arith.mulf %76, %84 : vector<1x128xf32>
    %93 = arith.addf %91, %92 : vector<1x128xf32>
    %94 = math.tanh %93 : vector<1x128xf32>
    %95 = arith.mulf %90, %94 : vector<1x128xf32>
    %96 = vector.extract_strided_slice %5 {offsets = [3, 0], sizes = [1, 512], strides = [1, 1]} : vector<8x512xf32> to vector<1x512xf32>
    %97 = vector.extract_strided_slice %95 {offsets = [0, 0], sizes = [1, 32], strides = [1, 1]} : vector<1x128xf32> to vector<1x32xf32>
    %cst_21 = arith.constant dense<0.000000e+00> : vector<1x512xf32>
    %98 = tpu.matmul %97, %6, %cst_21 {dimension_numbers = #tpu.dot_dimension_numbers<[1], [0], [0], [1], [0, 0, 1, 1], [], []>} : vector<1x32xf32>, vector<32x512xf32>, vector<1x512xf32> -> vector<1x512xf32>
    %99 = arith.addf %96, %98 : vector<1x512xf32>
    %100 = vector.extract_strided_slice %99 {offsets = [0, 0], sizes = [1, 128], strides = [1, 1]} : vector<1x512xf32> to vector<1x128xf32>
    %101 = arith.negf %100 : vector<1x128xf32>
    %102 = math.exp %101 : vector<1x128xf32>
    %cst_22 = arith.constant 1.000000e+00 : f32
    %103 = vector.broadcast %cst_22 : f32 to vector<1x128xf32>
    %104 = arith.addf %103, %102 : vector<1x128xf32>
    %105 = arith.divf %103, %104 : vector<1x128xf32>
    %106 = vector.extract_strided_slice %99 {offsets = [0, 128], sizes = [1, 128], strides = [1, 1]} : vector<1x512xf32> to vector<1x128xf32>
    %107 = arith.negf %106 : vector<1x128xf32>
    %108 = math.exp %107 : vector<1x128xf32>
    %cst_23 = arith.constant 1.000000e+00 : f32
    %109 = vector.broadcast %cst_23 : f32 to vector<1x128xf32>
    %110 = arith.addf %109, %108 : vector<1x128xf32>
    %111 = arith.divf %109, %110 : vector<1x128xf32>
    %112 = vector.extract_strided_slice %99 {offsets = [0, 256], sizes = [1, 128], strides = [1, 1]} : vector<1x512xf32> to vector<1x128xf32>
    %113 = math.tanh %112 : vector<1x128xf32>
    %114 = vector.extract_strided_slice %99 {offsets = [0, 384], sizes = [1, 128], strides = [1, 1]} : vector<1x512xf32> to vector<1x128xf32>
    %115 = arith.negf %114 : vector<1x128xf32>
    %116 = math.exp %115 : vector<1x128xf32>
    %cst_24 = arith.constant 1.000000e+00 : f32
    %117 = vector.broadcast %cst_24 : f32 to vector<1x128xf32>
    %118 = arith.addf %117, %116 : vector<1x128xf32>
    %119 = arith.divf %117, %118 : vector<1x128xf32>
    %120 = arith.mulf %111, %93 : vector<1x128xf32>
    %121 = arith.mulf %105, %113 : vector<1x128xf32>
    %122 = arith.addf %120, %121 : vector<1x128xf32>
    %123 = math.tanh %122 : vector<1x128xf32>
    %124 = arith.mulf %119, %123 : vector<1x128xf32>
    %125 = vector.extract_strided_slice %5 {offsets = [4, 0], sizes = [1, 512], strides = [1, 1]} : vector<8x512xf32> to vector<1x512xf32>
    %126 = vector.extract_strided_slice %124 {offsets = [0, 0], sizes = [1, 32], strides = [1, 1]} : vector<1x128xf32> to vector<1x32xf32>
    %cst_25 = arith.constant dense<0.000000e+00> : vector<1x512xf32>
    %127 = tpu.matmul %126, %6, %cst_25 {dimension_numbers = #tpu.dot_dimension_numbers<[1], [0], [0], [1], [0, 0, 1, 1], [], []>} : vector<1x32xf32>, vector<32x512xf32>, vector<1x512xf32> -> vector<1x512xf32>
    %128 = arith.addf %125, %127 : vector<1x512xf32>
    %129 = vector.extract_strided_slice %128 {offsets = [0, 0], sizes = [1, 128], strides = [1, 1]} : vector<1x512xf32> to vector<1x128xf32>
    %130 = arith.negf %129 : vector<1x128xf32>
    %131 = math.exp %130 : vector<1x128xf32>
    %cst_26 = arith.constant 1.000000e+00 : f32
    %132 = vector.broadcast %cst_26 : f32 to vector<1x128xf32>
    %133 = arith.addf %132, %131 : vector<1x128xf32>
    %134 = arith.divf %132, %133 : vector<1x128xf32>
    %135 = vector.extract_strided_slice %128 {offsets = [0, 128], sizes = [1, 128], strides = [1, 1]} : vector<1x512xf32> to vector<1x128xf32>
    %136 = arith.negf %135 : vector<1x128xf32>
    %137 = math.exp %136 : vector<1x128xf32>
    %cst_27 = arith.constant 1.000000e+00 : f32
    %138 = vector.broadcast %cst_27 : f32 to vector<1x128xf32>
    %139 = arith.addf %138, %137 : vector<1x128xf32>
    %140 = arith.divf %138, %139 : vector<1x128xf32>
    %141 = vector.extract_strided_slice %128 {offsets = [0, 256], sizes = [1, 128], strides = [1, 1]} : vector<1x512xf32> to vector<1x128xf32>
    %142 = math.tanh %141 : vector<1x128xf32>
    %143 = vector.extract_strided_slice %128 {offsets = [0, 384], sizes = [1, 128], strides = [1, 1]} : vector<1x512xf32> to vector<1x128xf32>
    %144 = arith.negf %143 : vector<1x128xf32>
    %145 = math.exp %144 : vector<1x128xf32>
    %cst_28 = arith.constant 1.000000e+00 : f32
    %146 = vector.broadcast %cst_28 : f32 to vector<1x128xf32>
    %147 = arith.addf %146, %145 : vector<1x128xf32>
    %148 = arith.divf %146, %147 : vector<1x128xf32>
    %149 = arith.mulf %140, %122 : vector<1x128xf32>
    %150 = arith.mulf %134, %142 : vector<1x128xf32>
    %151 = arith.addf %149, %150 : vector<1x128xf32>
    %152 = math.tanh %151 : vector<1x128xf32>
    %153 = arith.mulf %148, %152 : vector<1x128xf32>
    %154 = vector.extract_strided_slice %5 {offsets = [5, 0], sizes = [1, 512], strides = [1, 1]} : vector<8x512xf32> to vector<1x512xf32>
    %155 = vector.extract_strided_slice %153 {offsets = [0, 0], sizes = [1, 32], strides = [1, 1]} : vector<1x128xf32> to vector<1x32xf32>
    %cst_29 = arith.constant dense<0.000000e+00> : vector<1x512xf32>
    %156 = tpu.matmul %155, %6, %cst_29 {dimension_numbers = #tpu.dot_dimension_numbers<[1], [0], [0], [1], [0, 0, 1, 1], [], []>} : vector<1x32xf32>, vector<32x512xf32>, vector<1x512xf32> -> vector<1x512xf32>
    %157 = arith.addf %154, %156 : vector<1x512xf32>
    %158 = vector.extract_strided_slice %157 {offsets = [0, 0], sizes = [1, 128], strides = [1, 1]} : vector<1x512xf32> to vector<1x128xf32>
    %159 = arith.negf %158 : vector<1x128xf32>
    %160 = math.exp %159 : vector<1x128xf32>
    %cst_30 = arith.constant 1.000000e+00 : f32
    %161 = vector.broadcast %cst_30 : f32 to vector<1x128xf32>
    %162 = arith.addf %161, %160 : vector<1x128xf32>
    %163 = arith.divf %161, %162 : vector<1x128xf32>
    %164 = vector.extract_strided_slice %157 {offsets = [0, 128], sizes = [1, 128], strides = [1, 1]} : vector<1x512xf32> to vector<1x128xf32>
    %165 = arith.negf %164 : vector<1x128xf32>
    %166 = math.exp %165 : vector<1x128xf32>
    %cst_31 = arith.constant 1.000000e+00 : f32
    %167 = vector.broadcast %cst_31 : f32 to vector<1x128xf32>
    %168 = arith.addf %167, %166 : vector<1x128xf32>
    %169 = arith.divf %167, %168 : vector<1x128xf32>
    %170 = vector.extract_strided_slice %157 {offsets = [0, 256], sizes = [1, 128], strides = [1, 1]} : vector<1x512xf32> to vector<1x128xf32>
    %171 = math.tanh %170 : vector<1x128xf32>
    %172 = vector.extract_strided_slice %157 {offsets = [0, 384], sizes = [1, 128], strides = [1, 1]} : vector<1x512xf32> to vector<1x128xf32>
    %173 = arith.negf %172 : vector<1x128xf32>
    %174 = math.exp %173 : vector<1x128xf32>
    %cst_32 = arith.constant 1.000000e+00 : f32
    %175 = vector.broadcast %cst_32 : f32 to vector<1x128xf32>
    %176 = arith.addf %175, %174 : vector<1x128xf32>
    %177 = arith.divf %175, %176 : vector<1x128xf32>
    %178 = arith.mulf %169, %151 : vector<1x128xf32>
    %179 = arith.mulf %163, %171 : vector<1x128xf32>
    %180 = arith.addf %178, %179 : vector<1x128xf32>
    %181 = math.tanh %180 : vector<1x128xf32>
    %182 = arith.mulf %177, %181 : vector<1x128xf32>
    %183 = vector.extract_strided_slice %5 {offsets = [6, 0], sizes = [1, 512], strides = [1, 1]} : vector<8x512xf32> to vector<1x512xf32>
    %184 = vector.extract_strided_slice %182 {offsets = [0, 0], sizes = [1, 32], strides = [1, 1]} : vector<1x128xf32> to vector<1x32xf32>
    %cst_33 = arith.constant dense<0.000000e+00> : vector<1x512xf32>
    %185 = tpu.matmul %184, %6, %cst_33 {dimension_numbers = #tpu.dot_dimension_numbers<[1], [0], [0], [1], [0, 0, 1, 1], [], []>} : vector<1x32xf32>, vector<32x512xf32>, vector<1x512xf32> -> vector<1x512xf32>
    %186 = arith.addf %183, %185 : vector<1x512xf32>
    %187 = vector.extract_strided_slice %186 {offsets = [0, 0], sizes = [1, 128], strides = [1, 1]} : vector<1x512xf32> to vector<1x128xf32>
    %188 = arith.negf %187 : vector<1x128xf32>
    %189 = math.exp %188 : vector<1x128xf32>
    %cst_34 = arith.constant 1.000000e+00 : f32
    %190 = vector.broadcast %cst_34 : f32 to vector<1x128xf32>
    %191 = arith.addf %190, %189 : vector<1x128xf32>
    %192 = arith.divf %190, %191 : vector<1x128xf32>
    %193 = vector.extract_strided_slice %186 {offsets = [0, 128], sizes = [1, 128], strides = [1, 1]} : vector<1x512xf32> to vector<1x128xf32>
    %194 = arith.negf %193 : vector<1x128xf32>
    %195 = math.exp %194 : vector<1x128xf32>
    %cst_35 = arith.constant 1.000000e+00 : f32
    %196 = vector.broadcast %cst_35 : f32 to vector<1x128xf32>
    %197 = arith.addf %196, %195 : vector<1x128xf32>
    %198 = arith.divf %196, %197 : vector<1x128xf32>
    %199 = vector.extract_strided_slice %186 {offsets = [0, 256], sizes = [1, 128], strides = [1, 1]} : vector<1x512xf32> to vector<1x128xf32>
    %200 = math.tanh %199 : vector<1x128xf32>
    %201 = vector.extract_strided_slice %186 {offsets = [0, 384], sizes = [1, 128], strides = [1, 1]} : vector<1x512xf32> to vector<1x128xf32>
    %202 = arith.negf %201 : vector<1x128xf32>
    %203 = math.exp %202 : vector<1x128xf32>
    %cst_36 = arith.constant 1.000000e+00 : f32
    %204 = vector.broadcast %cst_36 : f32 to vector<1x128xf32>
    %205 = arith.addf %204, %203 : vector<1x128xf32>
    %206 = arith.divf %204, %205 : vector<1x128xf32>
    %207 = arith.mulf %198, %180 : vector<1x128xf32>
    %208 = arith.mulf %192, %200 : vector<1x128xf32>
    %209 = arith.addf %207, %208 : vector<1x128xf32>
    %210 = math.tanh %209 : vector<1x128xf32>
    %211 = arith.mulf %206, %210 : vector<1x128xf32>
    %212 = vector.extract_strided_slice %5 {offsets = [7, 0], sizes = [1, 512], strides = [1, 1]} : vector<8x512xf32> to vector<1x512xf32>
    %213 = vector.extract_strided_slice %211 {offsets = [0, 0], sizes = [1, 32], strides = [1, 1]} : vector<1x128xf32> to vector<1x32xf32>
    %cst_37 = arith.constant dense<0.000000e+00> : vector<1x512xf32>
    %214 = tpu.matmul %213, %6, %cst_37 {dimension_numbers = #tpu.dot_dimension_numbers<[1], [0], [0], [1], [0, 0, 1, 1], [], []>} : vector<1x32xf32>, vector<32x512xf32>, vector<1x512xf32> -> vector<1x512xf32>
    %215 = arith.addf %212, %214 : vector<1x512xf32>
    %216 = vector.extract_strided_slice %215 {offsets = [0, 0], sizes = [1, 128], strides = [1, 1]} : vector<1x512xf32> to vector<1x128xf32>
    %217 = arith.negf %216 : vector<1x128xf32>
    %218 = math.exp %217 : vector<1x128xf32>
    %cst_38 = arith.constant 1.000000e+00 : f32
    %219 = vector.broadcast %cst_38 : f32 to vector<1x128xf32>
    %220 = arith.addf %219, %218 : vector<1x128xf32>
    %221 = arith.divf %219, %220 : vector<1x128xf32>
    %222 = vector.extract_strided_slice %215 {offsets = [0, 128], sizes = [1, 128], strides = [1, 1]} : vector<1x512xf32> to vector<1x128xf32>
    %223 = arith.negf %222 : vector<1x128xf32>
    %224 = math.exp %223 : vector<1x128xf32>
    %cst_39 = arith.constant 1.000000e+00 : f32
    %225 = vector.broadcast %cst_39 : f32 to vector<1x128xf32>
    %226 = arith.addf %225, %224 : vector<1x128xf32>
    %227 = arith.divf %225, %226 : vector<1x128xf32>
    %228 = vector.extract_strided_slice %215 {offsets = [0, 256], sizes = [1, 128], strides = [1, 1]} : vector<1x512xf32> to vector<1x128xf32>
    %229 = math.tanh %228 : vector<1x128xf32>
    %230 = vector.extract_strided_slice %215 {offsets = [0, 384], sizes = [1, 128], strides = [1, 1]} : vector<1x512xf32> to vector<1x128xf32>
    %231 = arith.negf %230 : vector<1x128xf32>
    %232 = math.exp %231 : vector<1x128xf32>
    %cst_40 = arith.constant 1.000000e+00 : f32
    %233 = vector.broadcast %cst_40 : f32 to vector<1x128xf32>
    %234 = arith.addf %233, %232 : vector<1x128xf32>
    %235 = arith.divf %233, %234 : vector<1x128xf32>
    %236 = arith.mulf %227, %209 : vector<1x128xf32>
    %237 = arith.mulf %221, %229 : vector<1x128xf32>
    %238 = arith.addf %236, %237 : vector<1x128xf32>
    %239 = math.tanh %238 : vector<1x128xf32>
    %240 = arith.mulf %235, %239 : vector<1x128xf32>
    %241 = vector.extract_strided_slice %240 {offsets = [0, 0], sizes = [1, 32], strides = [1, 1]} : vector<1x128xf32> to vector<1x32xf32>
    %c0_41 = arith.constant 0 : index
    %c0_42 = arith.constant 0 : index
    %242 = vector.load %arg4[%c0_41, %c0_42] : memref<32x128xf32, #tpu.memory_space<vmem>>, vector<32x128xf32>
    %cst_43 = arith.constant dense<0.000000e+00> : vector<1x128xf32>
    %243 = tpu.matmul %241, %242, %cst_43 {dimension_numbers = #tpu.dot_dimension_numbers<[1], [0], [0], [1], [0, 0, 1, 1], [], []>} : vector<1x32xf32>, vector<32x128xf32>, vector<1x128xf32> -> vector<1x128xf32>
    %c0_44 = arith.constant 0 : index
    %c0_45 = arith.constant 0 : index
    %244 = vector.load %arg5[%c0_44, %c0_45] : memref<1x128xf32, #tpu.memory_space<vmem>>, vector<1x128xf32>
    %245 = arith.addf %243, %244 : vector<1x128xf32>
    %c0_46 = arith.constant 0 : index
    %c0_47 = arith.constant 0 : index
    %246 = vector.load %arg6[%c0_46, %c0_47] : memref<1x128xf32, #tpu.memory_space<vmem>>, vector<1x128xf32>
    tpu.vector_store %arg6[%c0_46, %c0_47], %245 {strides = array<i32>} : memref<1x128xf32, #tpu.memory_space<vmem>>, vector<1x128xf32>,
    return
  }
}

</mosaic_0001>

<bundles_post_ra>
// kernel: tpu_custom_call.1
= control target key start
LH: loop header
LB: loop body
LE: loop exit
PB: predicated region body
PF: predicated region fallthrough
CT: control target
= control target key end

     0   :  { %11 = vsyncpa [#allocation3], 0  ;;  %s2550_s0 = inlined_call_operand.vmem [shape: f32[8,4], index: 0, kind: input, shape index: {}]   ;;  %s2551_s1 = inlined_call_operand.hbm [shape: f32[4,512], index: 1, kind: input, shape index: {}]   ;;  %s2552_s2 = inlined_call_operand.hbm [shape: f32[32,512], index: 2, kind: input, shape index: {}]   ;;  %s2553_s3 = inlined_call_operand.vmem [shape: f32[1,512], index: 3, kind: input, shape index: {}]   ;;  %s2554_s4 = inlined_call_operand.hbm [shape: f32[32,128], index: 4, kind: input, shape index: {}]   ;;  %s2555_s5 = inlined_call_operand.vmem [shape: f32[1,128], index: 5, kind: input, shape index: {}]   ;;  %s2556_s6 = inlined_call_operand.hbm [shape: f32[1,128], index: 6, kind: output, shape index: {}]  }
   0x1   :  { %12 = vsyncpa [#allocation6], 0 }
   0x2   :  { %13 = vsyncpa [#allocation4], 0  ;;  %s2285_s21 = smov [#allocation5]   ;;  %s2191_s25 = scalar_lea.hbm %s2552_s2, 2048 }
   0x3   :  { %s31_s22 = sshll.u32 %s2285_s21, 4  ;;  %p2192_p0 = scmp.ne.s32.totalorder %s2552_s2, %s2191_s25  ;;  %s32_s22 = int_to_ptr.vmem [resolvable:$true] %s31_s22 }
   0x4   :  { %p2195_p1 = scmp.lt.u32.totalorder %s2191_s25, %s2552_s2 }
   0x6   :  { %p2197_p2 = pnand %p2195_p1, %p2192_p0 }
   0x8   :  { %2200 = shalt.err (!%p2197_p2)
}
   0x9   :  { %s2201_s30 = scalar_lea.vmem %s32_s22, 2048  ;;  %p2206_p4 = scmp.lt.s32.totalorder %s32_s22, %s32_s22 }
   0xa   :  { %p2202_p3 = scmp.ne.s32.totalorder %s32_s22, %s2201_s30  ;;  %p2207_p5 = scmp.lt.s32.totalorder %s2201_s30, %s2201_s30 }
   0xc   :  { %p2208_p6 = por %p2207_p5, %p2206_p4 }
   0xe   :  { %p2209_p7 = pnand %p2208_p6, %p2202_p3 }
  0x10   :  { %2212 = shalt.err (!%p2209_p7)
}
  0x11   :  { %s2286_s7 = smov 512   ;;  %s2287_s8 = smov 32  }
  0x12   :  { %37 = dma.hbm_to_vmem [thread:$0]  %s2552_s2, 2048, %s32_s22, [#allocation6], %s2286_s7, %s2286_s7, %s2287_s8  }
  0x13   :  { %s2288_s11 = smov [#allocation2]   ;;  %s2289_s13 = smov [#allocation7]  }
  0x14   :  { %s22_s12 = sshll.u32 %s2288_s11, 4  ;;  %s45_s14 = sshll.u32 %s2289_s13, 4  ;;  %s23_s12 = int_to_ptr.vmem [resolvable:$true] %s22_s12  ;;  %s46_s14 = int_to_ptr.vmem [resolvable:$true] %s45_s14 }
  0x15   :  { %s2213_s17 = scalar_lea.hbm %s2551_s1, 256 }
  0x16   :  { %p2214_p8 = scmp.ne.s32.totalorder %s2551_s1, %s2213_s17  ;;  %p2217_p9 = scmp.lt.u32.totalorder %s2213_s17, %s2551_s1 }
  0x18   :  { %p2219_p10 = pnand %p2217_p9, %p2214_p8 }
  0x1a   :  { %2222 = shalt.err (!%p2219_p10)
}
  0x1b   :  { %s2223_s2 = scalar_lea.vmem %s23_s12, 256  ;;  %p2228_p12 = scmp.lt.s32.totalorder %s23_s12, %s23_s12 }
  0x1c   :  { %p2224_p11 = scmp.ne.s32.totalorder %s23_s12, %s2223_s2  ;;  %p2229_p13 = scmp.lt.s32.totalorder %s2223_s2, %s2223_s2 }
  0x1e   :  { %p2230_p0 = por %p2229_p13, %p2228_p12 }
  0x20   :  { %p2231_p1 = pnand %p2230_p0, %p2224_p11 }
  0x22   :  { %2234 = shalt.err (!%p2231_p1)
}
  0x23   :  { %25 = dma.hbm_to_vmem [thread:$0]  %s2551_s1, 256, %s23_s12, [#allocation3]  }
  0x24   :  { %s2235_s26 = scalar_lea.hbm %s2554_s4, 512 }
  0x25   :  { %p2236_p2 = scmp.ne.s32.totalorder %s2554_s4, %s2235_s26  ;;  %p2239_p3 = scmp.lt.u32.totalorder %s2235_s26, %s2554_s4 }
  0x27   :  { %p2241_p4 = pnand %p2239_p3, %p2236_p2 }
  0x29   :  { %2244 = shalt.err (!%p2241_p4)
}
  0x2a   :  { %s2245_s7 = scalar_lea.vmem %s46_s14, 512  ;;  %p2250_p6 = scmp.lt.s32.totalorder %s46_s14, %s46_s14 }
  0x2b   :  { %p2246_p5 = scmp.ne.s32.totalorder %s46_s14, %s2245_s7  ;;  %p2251_p7 = scmp.lt.s32.totalorder %s2245_s7, %s2245_s7 }
  0x2d   :  { %p2252_p8 = por %p2251_p7, %p2250_p6 }
  0x2f   :  { %p2253_p9 = pnand %p2252_p8, %p2246_p5 }
  0x31   :  { %2256 = shalt.err (!%p2253_p9)
}
  0x32   :  { %s2290_s1 = smov 128   ;;  %s2291_s8 = smov 8  }
  0x33   :  { %51 = dma.hbm_to_vmem [thread:$0]  %s2554_s4, 512, %s46_s14, [#allocation6], %s2290_s1, %s2290_s1, %s2291_s8  }
  0x34   :  { %2279 = dma.done.wait [#allocation3], 256  }
  0x35   :  { %2280 = vsyncadd [#allocation3], 4294967040 }
  0x36   :  { %2281 = dma.done.wait [#allocation6], 2560  }
  0x37   :  { %2282 = vsyncadd [#allocation6], 4294964736  ;;  %v2292_v0 = vmov 0.0   ;;  %v248_v1 = vld [vmem:[#allocation5 + $0x8] sm:$0xff]  ;;  %v247_v3 = vld [vmem:[#allocation5] sm:$0xff]  ;;  %vm96_vm0 = vcmask 1043456   ;;  %v68_v30 = vlaneseq }
  0x38   :  { %169 = vmatprep.mubr.f32.mxu1 %v2292_v0  ;;  %331 = vmatprep.mubr.f32.mxu0 %v2292_v0  ;;  %v252_v2 = vld [vmem:[#allocation5 + $0x28] sm:$0xff]  ;;  %v251_v5 = vld [vmem:[#allocation5 + $0x20] sm:$0xff]  ;;  %v64_v6 = vld [vmem:[#allocation2] sm:$0xff]  ;;  %vm92_vm1 = vcmask 31744   ;;  %vm263_vm2 = vcmask 261120   ;;  %vm2294_vm3 = vmmov 0  }
  0x39   :  { %v2369_v4 = vpack.c.bf16 %v252_v2, %v248_v1  ;;  %v256_v7 = vld [vmem:[#allocation5 + $0x48] sm:$0xff]  ;;  %v2371_v8 = vpack.c.bf16 %v251_v5, %v247_v3  ;;  %v90_v9 = vcombine.high %v64_v6, %v64_v6  ;;  %v63_v11 = vld [vmem:[%s2550_s0] sm:$0xff]  ;;  %v255_v12 = vld [vmem:[#allocation5 + $0x40] sm:$0xff]  ;;  %v69_v31 = vshrl.u32 %v68_v30, 7  ;;  %s2295_s14 = smov [#allocation8]  }
  0x3a   :  { %v260_v10 = vld [vmem:[#allocation5 + $0x68] sm:$0xff]  ;;  %v259_v14 = vld [vmem:[#allocation5 + $0x60] sm:$0xff]  ;;  %v65_v15 = vld [vmem:[#allocation2 + $0x8] sm:$0xff]  ;;  %s1845_s15 = sshll.u32 %s2295_s14, 4  ;;  %s1846_s15 = int_to_ptr.vmem [resolvable:$true] %s1845_s15 }
  0x3b   :  { %1917 = vmatprep.subr.bf16.mxu0 %v2369_v4  ;;  %v2377_v13 = vpack.c.bf16 %v260_v10, %v256_v7  ;;  %v250_v16 = vld [vmem:[#allocation5 + $0x18] sm:$0xff]  ;;  %1855 = vmatprep.subr.msk.mxu1 %vm96_vm0, %v90_v9  ;;  %v2381_v17 = vpack.c.bf16 %v259_v14, %v255_v12  ;;  %v91_v18 = vcombine.high %v65_v15, %v65_v15  ;;  %v249_v20 = vld [vmem:[#allocation5 + $0x10] sm:$0xff]  ;;  %v70_v32 = vsub.s32 0, %v69_v31  ;;  %s2257_s16 = scalar_lea.vmem %s1846_s15, 16  ;;  %s2261_s17 = scalar_lea.vmem %s1846_s15, 32 }
  0x3c   :  { %1919 = vmatpush1.bf16.msra.mxu0 %v2371_v8  ;;  %v254_v19 = vld [vmem:[#allocation5 + $0x38] sm:$0xff]  ;;  %v253_v21 = vld [vmem:[#allocation5 + $0x30] sm:$0xff]  ;;  %1856 = vmatpush1.msk.msra.mxu1 %vm96_vm0, %v64_v6  ;;  %v74_v34 = vsub.s32 1, %v69_v31  ;;  %v82_v40 = vsub.s32 3, %v69_v31  ;;  %v78_v47 = vsub.s32 2, %v69_v31  ;;  %p2258_p10 = scmp.ne.s32.totalorder %s1846_s15, %s2257_s16  ;;  %p2262_p11 = scmp.lt.s32.totalorder %s1846_s15, %s1846_s15 }
  0x3d   :  { %1921 = vmatprep.subr.bf16.mxu0 %v2377_v13  ;;  %v2385_v22 = vpack.c.bf16 %v254_v19, %v250_v16  ;;  %v258_v23 = vld [vmem:[#allocation5 + $0x58] sm:$0xff]  ;;  %1857 = vmatmul.mubr.msk.f32.vlgmr.msra.gmra.mrb[0].mxu1 %vm92_vm1, %v63_v11  ;;  %v2391_v25 = vpack.c.bf16 %v253_v21, %v249_v20  ;;  %v257_v27 = vld [vmem:[#allocation5 + $0x50] sm:$0xff]  ;;  %p2263_p12 = scmp.lt.s32.totalorder %s2261_s17, %s2257_s16 }
  0x3e   :  { %v262_v24 = vld [vmem:[#allocation5 + $0x78] sm:$0xff]  ;;  %1858 = vmatprep.subr.msk.mxu1 %vm96_vm0, %v91_v18  ;;  %240 = vmatprep.mubr.f32.mxu1 %v2292_v0  ;;  %v261_v28 = vld [vmem:[#allocation5 + $0x70] sm:$0xff] }
  0x3f   :  { %1859 = vmatpush1.msk.msra.mxu1 %vm96_vm0, %v65_v15  ;;  %v2395_v26 = vpack.c.bf16 %v262_v24, %v258_v23  ;;  %v2401_v29 = vpack.c.bf16 %v261_v28, %v257_v27  ;;  %v66_v33 = vld [vmem:[%s2553_s3] sm:$0xf]  ;;  %p2264_p13 = por %p2263_p12, %p2262_p11 }
  0x40   :  { %1923 = vmatpush1.bf16.msra.mxu0 %v2381_v17  ;;  %1925 = vmatprep.subr.bf16.mxu1 %v2385_v22  ;;  %v71_v35 = vrot.slane %v66_v33, %v70_v32  ;;  %v75_v36 = vrot.slane %v66_v33, %v74_v34  ;;  %v83_v48 = vrot.slane %v66_v33, %v82_v40 }
  0x41   :  { %1933 = vmatprep.subr.bf16.mxu0 %v2369_v4  ;;  %1860 = vmatmul.mubr.msk.f32.vlgmr.msra.gmra.mrb[2].mxu1 %vm92_vm1, %v63_v11  ;;  %v79_v52 = vrot.slane %v66_v33, %v78_v47  ;;  %p2265_p0 = pnand %p2264_p13, %p2258_p10 }
  0x42   :  { %1927 = vmatpush1.bf16.msra.mxu1 %v2391_v25  ;;  %402 = vmatprep.mubr.f32.mxu1 %v2292_v0 }
  0x43   :  { %332 = vmatmul.mubr.f32.vlgmr.msra.gmra.mrb[0].mxu0 %v2292_v0  ;;  %1929 = vmatprep.subr.bf16.mxu1 %v2395_v26 }
  0x44   :  { %1935 = vmatpush1.bf16.msra.mxu0 %v2371_v8  ;;  %504 = vmatprep.mubr.f32.mxu0 %v2292_v0 }
  0x45   :  { %1937 = vmatprep.subr.bf16.mxu0 %v2377_v13 }
  0x46   :  { %1931 = vmatpush1.bf16.msra.mxu1 %v2401_v29 }
  0x47   :  { %1941 = vmatprep.subr.bf16.mxu1 %v2385_v22 }
  0x48   :  { %1939 = vmatpush1.bf16.msra.mxu0 %v2381_v17 }
  0x49   :  { %403 = vmatmul.mubr.f32.vlgmr.msra.gmra.mrb[4].mxu1 %v2292_v0  ;;  %1949 = vmatprep.subr.bf16.mxu0 %v2369_v4 }
  0x4a   :  { %1943 = vmatpush1.bf16.msra.mxu1 %v2391_v25  ;;  %575 = vmatprep.mubr.f32.mxu1 %v2292_v0 }
  0x4b   :  { %1945 = vmatprep.subr.bf16.mxu1 %v2395_v26 }
  0x4e   :  { %1947 = vmatpush1.bf16.msra.mxu1 %v2401_v29 }
  0x4f   :  { %1957 = vmatprep.subr.bf16.mxu1 %v2385_v22 }
 0x110   :  { %v171_v37 = vpop.f32.mrb[0].mxu1 }
 0x111   :  { %v173_v38 = vpop.f32.mrb[1].mxu1  ;;  %v2421_v39 = vadd.f32 %v171_v37, %v71_v35 }
 0x112   :  { %v2423_v41 = vadd.f32 %v173_v38, %v75_v36 }
 0x114   :  { %v242_v42 = vpop.f32.mrb[2].mxu1 }
 0x115   :  { %v244_v44 = vpop.f32.mrb[3].mxu1  ;;  %v2429_v56 = vadd.f32 %v242_v42, %v79_v52 }
 0x116   :  { %v333_v43 = vpop.f32.mrb[0].mxu0  ;;  %v2427_v53 = vadd.f32 %v244_v44, %v83_v48 }
 0x117   :  { %v409_v45 = vadd.f32 %v333_v43, %v2421_v39  ;;  %v335_v46 = vpop.f32.mrb[1].mxu0 }
 0x118   :  { %v410_v49 = vadd.f32 %v335_v46, %v2423_v41 }
 0x119   :  { %v1861_v50 = vmul.f32 -1.442695, %v409_v45 }
 0x11a   :  { %v1862_v51 = vmul.f32 -1.442695, %v410_v49 }
 0x11b   :  { %2063 = vpow2.f32 %v1861_v50 }
 0x11c   :  { %2065 = vpow2.f32 %v1862_v51  ;;  %v404_v54 = vpop.f32.mrb[4].mxu1 }
 0x11d   :  { %v406_v55 = vpop.f32.mrb[5].mxu1  ;;  %v411_v59 = vadd.f32 %v404_v54, %v2429_v56 }
 0x11e   :  { %v412_v57 = vadd.f32 %v406_v55, %v2427_v53 }
 0x120   :  { %v1863_v58 = vmul.f32 -1.442695, %v412_v57 }
 0x122   :  { %2067 = vpow2.f32 %v1863_v58 }
 0x123   :  { %2069 = vtanh.f32 %v411_v59 }
 0x125   :  { %v2064_v60 = vpop.eup %2063 }
 0x126   :  { %v2066_v61 = vpop.eup %2065  ;;  %v416_v62 = vadd.f32 1.0, %v2064_v60 }
 0x127   :  { %v422_v63 = vadd.f32 1.0, %v2066_v61 }
 0x128   :  { %2071 = vrcp.f32 %v416_v62 }
 0x129   :  { %2073 = vrcp.f32 %v422_v63 }
 0x12c   :  { %v2068_v1 = vpop.eup %2067 }
 0x12d   :  { %v2070_v2 = vpop.eup %2069  ;;  %v429_v7 = vadd.f32 1.0, %v2068_v1 }
 0x12f   :  { %2075 = vrcp.f32 %v429_v7 }
 0x132   :  { %v2072_v3 = vpop.eup %2071 }
 0x133   :  { %v2074_v5 = vpop.eup %2073  ;;  %v433_v6 = vmul.f32 %v2072_v3, %v2070_v2 }
 0x134   :  { %v432_v9 = vmul.f32 0.0, %v2074_v5 }
 0x136   :  { %v434_v10 = vadd.f32 %v433_v6, %v432_v9 }
 0x138   :  { %2077 = vtanh.f32 %v434_v10  ;;  %v618_v44 = vrot.slane %v434_v10, 7 }
 0x139   :  { %v2076_v11 = vpop.eup %2075 }
 0x142   :  { %v2078_v12 = vpop.eup %2077 }
 0x143   :  { %v436_v14 = vmul.f32 %v2078_v12, %v2076_v11 }
 0x145   :  { %1864 = vmatmul.mubr.msk.f32.vlgmr.msra.gmra.mrb[2].mxu0 %vm263_vm2, %v436_v14  ;;  %1865 = vmatmul.mubr.msk.f32.vlgmr.msra.gmra.mrb[6].mxu1 %vm263_vm2, %v436_v14 }
 0x146   :  { %1951 = vmatpush1.bf16.msra.mxu0 %v2371_v8  ;;  %1959 = vmatpush1.bf16.msra.mxu1 %v2391_v25 }
 0x147   :  { %1953 = vmatprep.subr.bf16.mxu0 %v2377_v13  ;;  %1961 = vmatprep.subr.bf16.mxu1 %v2395_v26 }
 0x148   :  { %693 = vmatprep.mubr.f32.mxu0 %v2292_v0  ;;  %764 = vmatprep.mubr.f32.mxu1 %v2292_v0 }
 0x14a   :  { %1955 = vmatpush1.bf16.msra.mxu0 %v2381_v17  ;;  %1963 = vmatpush1.bf16.msra.mxu1 %v2401_v29 }
 0x14b   :  { %1965 = vmatprep.subr.bf16.mxu0 %v2369_v4  ;;  %1973 = vmatprep.subr.bf16.mxu1 %v2385_v22 }
 0x218   :  { %v506_v15 = vpop.f32.mrb[2].mxu0  ;;  %v577_v16 = vpop.f32.mrb[6].mxu1 }
 0x219   :  { %v586_v18 = vrot.slane %v506_v15, 7  ;;  %v508_v19 = vpop.f32.mrb[3].mxu0  ;;  %v579_v20 = vpop.f32.mrb[7].mxu1  ;;  %v588_v32 = vrot.slane %v577_v16, 7 }
 0x21a   :  { %v587_v21 = vrot.slane %v508_v19, 7  ;;  %v589_v30 = vrot.slane %v579_v20, 7 }
 0x21b   :  { %v594_v23 = vadd.f32 %v586_v18, %v2421_v39  ;;  %v596_v34 = vadd.f32 %v588_v32, %v2429_v56 }
 0x21c   :  { %v595_v24 = vadd.f32 %v587_v21, %v2423_v41  ;;  %v597_v31 = vadd.f32 %v589_v30, %v2427_v53 }
 0x21d   :  { %v1866_v27 = vmul.f32 -1.442695, %v594_v23 }
 0x21e   :  { %v1867_v28 = vmul.f32 -1.442695, %v595_v24  ;;  %v1868_v33 = vmul.f32 -1.442695, %v597_v31 }
 0x21f   :  { %2079 = vpow2.f32 %v1866_v27 }
 0x220   :  { %2081 = vpow2.f32 %v1867_v28 }
 0x221   :  { %2083 = vpow2.f32 %v1868_v33 }
 0x222   :  { %2085 = vtanh.f32 %v596_v34 }
 0x229   :  { %v2080_v35 = vpop.eup %2079 }
 0x22a   :  { %v2082_v36 = vpop.eup %2081  ;;  %v601_v37 = vadd.f32 1.0, %v2080_v35 }
 0x22b   :  { %v607_v38 = vadd.f32 1.0, %v2082_v36  ;;  %v2084_v40 = vpop.eup %2083 }
 0x22c   :  { %2087 = vrcp.f32 %v601_v37  ;;  %v2086_v42 = vpop.eup %2085  ;;  %v614_v47 = vadd.f32 1.0, %v2084_v40 }
 0x22d   :  { %2089 = vrcp.f32 %v607_v38 }
 0x22e   :  { %2091 = vrcp.f32 %v614_v47 }
 0x236   :  { %v2088_v43 = vpop.eup %2087 }
 0x237   :  { %v2090_v45 = vpop.eup %2089  ;;  %v621_v46 = vmul.f32 %v2088_v43, %v2086_v42 }
 0x238   :  { %v620_v48 = vmul.f32 %v2090_v45, %v618_v44  ;;  %v2092_v50 = vpop.eup %2091 }
 0x23a   :  { %v622_v49 = vadd.f32 %v621_v46, %v620_v48 }
 0x23c   :  { %2093 = vtanh.f32 %v622_v49  ;;  %v807_v19 = vrot.slane %v622_v49, 7 }
 0x246   :  { %v2094_v51 = vpop.eup %2093 }
 0x247   :  { %v624_v52 = vmul.f32 %v2094_v51, %v2092_v50 }
 0x249   :  { %v626_v54 = vrot.slane %v624_v52, 1 }
 0x24b   :  { %1869 = vmatmul.mubr.msk.f32.vlgmr.msra.gmra.mrb[4].mxu0 %vm263_vm2, %v626_v54  ;;  %1870 = vmatmul.mubr.msk.f32.vlgmr.msra.gmra.mrb[8].mxu1 %vm263_vm2, %v626_v54 }
 0x24c   :  { %1967 = vmatpush1.bf16.msra.mxu0 %v2371_v8  ;;  %1975 = vmatpush1.bf16.msra.mxu1 %v2391_v25 }
 0x24d   :  { %1969 = vmatprep.subr.bf16.mxu0 %v2377_v13  ;;  %1977 = vmatprep.subr.bf16.mxu1 %v2395_v26 }
 0x24e   :  { %882 = vmatprep.mubr.f32.mxu0 %v2292_v0  ;;  %953 = vmatprep.mubr.f32.mxu1 %v2292_v0 }
 0x250   :  { %1971 = vmatpush1.bf16.msra.mxu0 %v2381_v17  ;;  %1979 = vmatpush1.bf16.msra.mxu1 %v2401_v29 }
 0x251   :  { %1981 = vmatprep.subr.bf16.mxu0 %v2369_v4  ;;  %1989 = vmatprep.subr.bf16.mxu1 %v2385_v22 }
 0x31e   :  { %v695_v55 = vpop.f32.mrb[4].mxu0  ;;  %v766_v57 = vpop.f32.mrb[8].mxu1 }
 0x31f   :  { %v775_v58 = vrot.slane %v695_v55, 6  ;;  %v697_v59 = vpop.f32.mrb[5].mxu0  ;;  %v768_v60 = vpop.f32.mrb[9].mxu1  ;;  %v777_v6 = vrot.slane %v766_v57, 6 }
 0x320   :  { %v776_v61 = vrot.slane %v697_v59, 6  ;;  %v778_v3 = vrot.slane %v768_v60, 6 }
 0x321   :  { %v783_v62 = vadd.f32 %v775_v58, %v2421_v39  ;;  %v785_v9 = vadd.f32 %v777_v6, %v2429_v56 }
 0x322   :  { %v784_v63 = vadd.f32 %v776_v61, %v2423_v41  ;;  %v786_v5 = vadd.f32 %v778_v3, %v2427_v53 }
 0x323   :  { %v1871_v1 = vmul.f32 -1.442695, %v783_v62 }
 0x324   :  { %v1872_v2 = vmul.f32 -1.442695, %v784_v63  ;;  %v1873_v7 = vmul.f32 -1.442695, %v786_v5 }
 0x325   :  { %2095 = vpow2.f32 %v1871_v1 }
 0x326   :  { %2097 = vpow2.f32 %v1872_v2 }
 0x327   :  { %2099 = vpow2.f32 %v1873_v7 }
 0x328   :  { %2101 = vtanh.f32 %v785_v9 }
 0x32f   :  { %v2096_v10 = vpop.eup %2095 }
 0x330   :  { %v2098_v11 = vpop.eup %2097  ;;  %v790_v12 = vadd.f32 1.0, %v2096_v10 }
 0x331   :  { %v796_v14 = vadd.f32 1.0, %v2098_v11  ;;  %v2100_v15 = vpop.eup %2099 }
 0x332   :  { %2103 = vrcp.f32 %v790_v12  ;;  %v2102_v16 = vpop.eup %2101  ;;  %v803_v23 = vadd.f32 1.0, %v2100_v15 }
 0x333   :  { %2105 = vrcp.f32 %v796_v14 }
 0x334   :  { %2107 = vrcp.f32 %v803_v23 }
 0x33c   :  { %v2104_v18 = vpop.eup %2103 }
 0x33d   :  { %v2106_v20 = vpop.eup %2105  ;;  %v810_v21 = vmul.f32 %v2104_v18, %v2102_v16 }
 0x33e   :  { %v809_v24 = vmul.f32 %v2106_v20, %v807_v19  ;;  %v2108_v28 = vpop.eup %2107 }
 0x340   :  { %v811_v27 = vadd.f32 %v810_v21, %v809_v24 }
 0x342   :  { %2109 = vtanh.f32 %v811_v27  ;;  %v996_v59 = vrot.slane %v811_v27, 7 }
 0x34c   :  { %v2110_v30 = vpop.eup %2109 }
 0x34d   :  { %v813_v31 = vmul.f32 %v2110_v30, %v2108_v28 }
 0x34f   :  { %v815_v32 = vrot.slane %v813_v31, 2 }
 0x351   :  { %1874 = vmatmul.mubr.msk.f32.vlgmr.msra.gmra.mrb[6].mxu0 %vm263_vm2, %v815_v32  ;;  %1875 = vmatmul.mubr.msk.f32.vlgmr.msra.gmra.mrb[10].mxu1 %vm263_vm2, %v815_v32 }
 0x352   :  { %1983 = vmatpush1.bf16.msra.mxu0 %v2371_v8  ;;  %1991 = vmatpush1.bf16.msra.mxu1 %v2391_v25 }
 0x353   :  { %1985 = vmatprep.subr.bf16.mxu0 %v2377_v13  ;;  %1993 = vmatprep.subr.bf16.mxu1 %v2395_v26 }
 0x354   :  { %1071 = vmatprep.mubr.f32.mxu0 %v2292_v0  ;;  %1142 = vmatprep.mubr.f32.mxu1 %v2292_v0 }
 0x356   :  { %1987 = vmatpush1.bf16.msra.mxu0 %v2381_v17  ;;  %1995 = vmatpush1.bf16.msra.mxu1 %v2401_v29 }
 0x357   :  { %1997 = vmatprep.subr.bf16.mxu0 %v2369_v4  ;;  %2005 = vmatprep.subr.bf16.mxu1 %v2385_v22 }
 0x424   :  { %v884_v33 = vpop.f32.mrb[6].mxu0  ;;  %v955_v34 = vpop.f32.mrb[10].mxu1 }
 0x425   :  { %v964_v35 = vrot.slane %v884_v33, 5  ;;  %v886_v36 = vpop.f32.mrb[7].mxu0  ;;  %v957_v37 = vpop.f32.mrb[11].mxu1  ;;  %v966_v47 = vrot.slane %v955_v34, 5 }
 0x426   :  { %v965_v38 = vrot.slane %v886_v36, 5  ;;  %v967_v45 = vrot.slane %v957_v37, 5 }
 0x427   :  { %v972_v40 = vadd.f32 %v964_v35, %v2421_v39  ;;  %v974_v49 = vadd.f32 %v966_v47, %v2429_v56 }
 0x428   :  { %v973_v42 = vadd.f32 %v965_v38, %v2423_v41  ;;  %v975_v46 = vadd.f32 %v967_v45, %v2427_v53 }
 0x429   :  { %v1876_v43 = vmul.f32 -1.442695, %v972_v40 }
 0x42a   :  { %v1877_v44 = vmul.f32 -1.442695, %v973_v42  ;;  %v1878_v48 = vmul.f32 -1.442695, %v975_v46 }
 0x42b   :  { %2111 = vpow2.f32 %v1876_v43 }
 0x42c   :  { %2113 = vpow2.f32 %v1877_v44 }
 0x42d   :  { %2115 = vpow2.f32 %v1878_v48 }
 0x42e   :  { %2117 = vtanh.f32 %v974_v49 }
 0x435   :  { %v2112_v50 = vpop.eup %2111 }
 0x436   :  { %v2114_v51 = vpop.eup %2113  ;;  %v979_v52 = vadd.f32 1.0, %v2112_v50 }
 0x437   :  { %v985_v54 = vadd.f32 1.0, %v2114_v51  ;;  %v2116_v55 = vpop.eup %2115 }
 0x438   :  { %2119 = vrcp.f32 %v979_v52  ;;  %v2118_v57 = vpop.eup %2117  ;;  %v992_v62 = vadd.f32 1.0, %v2116_v55 }
 0x439   :  { %2121 = vrcp.f32 %v985_v54 }
 0x43a   :  { %2123 = vrcp.f32 %v992_v62 }
 0x442   :  { %v2120_v58 = vpop.eup %2119 }
 0x443   :  { %v2122_v60 = vpop.eup %2121  ;;  %v999_v61 = vmul.f32 %v2120_v58, %v2118_v57 }
 0x444   :  { %v998_v63 = vmul.f32 %v2122_v60, %v996_v59  ;;  %v2124_v2 = vpop.eup %2123 }
 0x446   :  { %v1000_v1 = vadd.f32 %v999_v61, %v998_v63 }
 0x448   :  { %2125 = vtanh.f32 %v1000_v1  ;;  %v1185_v36 = vrot.slane %v1000_v1, 7 }
 0x452   :  { %v2126_v3 = vpop.eup %2125 }
 0x453   :  { %v1002_v5 = vmul.f32 %v2126_v3, %v2124_v2 }
 0x455   :  { %v1004_v6 = vrot.slane %v1002_v5, 3 }
 0x457   :  { %1879 = vmatmul.mubr.msk.f32.vlgmr.msra.gmra.mrb[8].mxu0 %vm263_vm2, %v1004_v6  ;;  %1880 = vmatmul.mubr.msk.f32.vlgmr.msra.gmra.mrb[12].mxu1 %vm263_vm2, %v1004_v6 }
 0x458   :  { %1999 = vmatpush1.bf16.msra.mxu0 %v2371_v8  ;;  %2007 = vmatpush1.bf16.msra.mxu1 %v2391_v25 }
 0x459   :  { %2001 = vmatprep.subr.bf16.mxu0 %v2377_v13  ;;  %2009 = vmatprep.subr.bf16.mxu1 %v2395_v26 }
 0x45a   :  { %1260 = vmatprep.mubr.f32.mxu0 %v2292_v0  ;;  %1331 = vmatprep.mubr.f32.mxu1 %v2292_v0 }
 0x45c   :  { %2003 = vmatpush1.bf16.msra.mxu0 %v2381_v17  ;;  %2011 = vmatpush1.bf16.msra.mxu1 %v2401_v29 }
 0x45d   :  { %2013 = vmatprep.subr.bf16.mxu0 %v2369_v4  ;;  %2021 = vmatprep.subr.bf16.mxu1 %v2385_v22 }
 0x52a   :  { %v1073_v7 = vpop.f32.mrb[8].mxu0  ;;  %v1144_v9 = vpop.f32.mrb[12].mxu1 }
 0x52b   :  { %v1153_v10 = vrot.slane %v1073_v7, 4  ;;  %v1075_v11 = vpop.f32.mrb[9].mxu0  ;;  %v1146_v12 = vpop.f32.mrb[13].mxu1  ;;  %v1155_v23 = vrot.slane %v1144_v9, 4 }
 0x52c   :  { %v1154_v14 = vrot.slane %v1075_v11, 4  ;;  %v1156_v20 = vrot.slane %v1146_v12, 4 }
 0x52d   :  { %v1161_v15 = vadd.f32 %v1153_v10, %v2421_v39  ;;  %v1163_v27 = vadd.f32 %v1155_v23, %v2429_v56 }
 0x52e   :  { %v1162_v16 = vadd.f32 %v1154_v14, %v2423_v41  ;;  %v1164_v21 = vadd.f32 %v1156_v20, %v2427_v53 }
 0x52f   :  { %v1881_v18 = vmul.f32 -1.442695, %v1161_v15 }
 0x530   :  { %v1882_v19 = vmul.f32 -1.442695, %v1162_v16  ;;  %v1883_v24 = vmul.f32 -1.442695, %v1164_v21 }
 0x531   :  { %2127 = vpow2.f32 %v1881_v18 }
 0x532   :  { %2129 = vpow2.f32 %v1882_v19 }
 0x533   :  { %2131 = vpow2.f32 %v1883_v24 }
 0x534   :  { %2133 = vtanh.f32 %v1163_v27 }
 0x53b   :  { %v2128_v28 = vpop.eup %2127 }
 0x53c   :  { %v2130_v30 = vpop.eup %2129  ;;  %v1168_v31 = vadd.f32 1.0, %v2128_v28 }
 0x53d   :  { %v1174_v32 = vadd.f32 1.0, %v2130_v30  ;;  %v2132_v33 = vpop.eup %2131 }
 0x53e   :  { %2135 = vrcp.f32 %v1168_v31  ;;  %v2134_v34 = vpop.eup %2133  ;;  %v1181_v40 = vadd.f32 1.0, %v2132_v33 }
 0x53f   :  { %2137 = vrcp.f32 %v1174_v32 }
 0x540   :  { %2139 = vrcp.f32 %v1181_v40 }
 0x548   :  { %v2136_v35 = vpop.eup %2135 }
 0x549   :  { %v2138_v37 = vpop.eup %2137  ;;  %v1188_v38 = vmul.f32 %v2136_v35, %v2134_v34 }
 0x54a   :  { %v1187_v42 = vmul.f32 %v2138_v37, %v1185_v36  ;;  %v2140_v44 = vpop.eup %2139 }
 0x54c   :  { %v1189_v43 = vadd.f32 %v1188_v38, %v1187_v42 }
 0x54e   :  { %2141 = vtanh.f32 %v1189_v43  ;;  %v1374_v9 = vrot.slane %v1189_v43, 7 }
 0x558   :  { %v2142_v45 = vpop.eup %2141 }
 0x559   :  { %v1191_v46 = vmul.f32 %v2142_v45, %v2140_v44 }
 0x55b   :  { %v1193_v47 = vrot.slane %v1191_v46, 4 }
 0x55d   :  { %1884 = vmatmul.mubr.msk.f32.vlgmr.msra.gmra.mrb[10].mxu0 %vm263_vm2, %v1193_v47  ;;  %1885 = vmatmul.mubr.msk.f32.vlgmr.msra.gmra.mrb[14].mxu1 %vm263_vm2, %v1193_v47 }
 0x55e   :  { %2015 = vmatpush1.bf16.msra.mxu0 %v2371_v8  ;;  %2023 = vmatpush1.bf16.msra.mxu1 %v2391_v25 }
 0x55f   :  { %2017 = vmatprep.subr.bf16.mxu0 %v2377_v13  ;;  %2025 = vmatprep.subr.bf16.mxu1 %v2395_v26 }
 0x560   :  { %1449 = vmatprep.mubr.f32.mxu0 %v2292_v0  ;;  %1520 = vmatprep.mubr.f32.mxu1 %v2292_v0 }
 0x562   :  { %2019 = vmatpush1.bf16.msra.mxu0 %v2381_v17  ;;  %2027 = vmatpush1.bf16.msra.mxu1 %v2401_v29 }
 0x563   :  { %2029 = vmatprep.subr.bf16.mxu0 %v2369_v4  ;;  %2037 = vmatprep.subr.bf16.mxu1 %v2385_v22 }
 0x630   :  { %v1262_v48 = vpop.f32.mrb[10].mxu0  ;;  %v1333_v49 = vpop.f32.mrb[14].mxu1 }
 0x631   :  { %v1342_v50 = vrot.slane %v1262_v48, 3  ;;  %v1264_v51 = vpop.f32.mrb[11].mxu0  ;;  %v1335_v52 = vpop.f32.mrb[15].mxu1  ;;  %v1344_v4 = vrot.slane %v1333_v49, 3 }
 0x632   :  { %v1343_v54 = vrot.slane %v1264_v51, 3  ;;  %v1345_v60 = vrot.slane %v1335_v52, 3 }
 0x633   :  { %v1350_v55 = vadd.f32 %v1342_v50, %v2421_v39  ;;  %v1352_v22 = vadd.f32 %v1344_v4, %v2429_v56 }
 0x634   :  { %v1351_v57 = vadd.f32 %v1343_v54, %v2423_v41  ;;  %v1353_v61 = vadd.f32 %v1345_v60, %v2427_v53  ;;  %v1759_v54 = vld [vmem:[#allocation7] sm:$0xff]  ;;  %v1762_v60 = vld [vmem:[#allocation7 + $0x18] sm:$0xff] }
 0x635   :  { %v1886_v58 = vmul.f32 -1.442695, %v1350_v55  ;;  %v1760_v55 = vld [vmem:[#allocation7 + $0x8] sm:$0xff] }
 0x636   :  { %v1887_v59 = vmul.f32 -1.442695, %v1351_v57  ;;  %v1888_v62 = vmul.f32 -1.442695, %v1353_v61  ;;  %v1761_v57 = vld [vmem:[#allocation7 + $0x10] sm:$0xff] }
 0x637   :  { %2143 = vpow2.f32 %v1886_v58  ;;  %v2293_v58 = vmov 0.0|0.0   ;;  %v2048_v61 = vpack.c.bf16 %v1762_v60, %v1761_v57 }
 0x638   :  { %2145 = vpow2.f32 %v1887_v59  ;;  %v2045_v59 = vpack.c.bf16 %v1760_v55, %v1759_v54 }
 0x639   :  { %2147 = vpow2.f32 %v1888_v62 }
 0x63a   :  { %2149 = vtanh.f32 %v1352_v22 }
 0x641   :  { %v2144_v63 = vpop.eup %2143 }
 0x642   :  { %v2146_v1 = vpop.eup %2145  ;;  %v1357_v2 = vadd.f32 1.0, %v2144_v63 }
 0x643   :  { %v1363_v3 = vadd.f32 1.0, %v2146_v1  ;;  %v2148_v5 = vpop.eup %2147 }
 0x644   :  { %2151 = vrcp.f32 %v1357_v2  ;;  %v2150_v6 = vpop.eup %2149  ;;  %v1370_v12 = vadd.f32 1.0, %v2148_v5 }
 0x645   :  { %2153 = vrcp.f32 %v1363_v3 }
 0x646   :  { %2155 = vrcp.f32 %v1370_v12 }
 0x64e   :  { %v2152_v7 = vpop.eup %2151 }
 0x64f   :  { %v2154_v10 = vpop.eup %2153  ;;  %v1377_v11 = vmul.f32 %v2152_v7, %v2150_v6 }
 0x650   :  { %v1376_v14 = vmul.f32 %v2154_v10, %v1374_v9  ;;  %v2156_v16 = vpop.eup %2155 }
 0x652   :  { %v1378_v15 = vadd.f32 %v1377_v11, %v1376_v14 }
 0x654   :  { %2157 = vtanh.f32 %v1378_v15  ;;  %v1563_v43 = vrot.slane %v1378_v15, 7 }
 0x65e   :  { %v2158_v18 = vpop.eup %2157 }
 0x65f   :  { %v1380_v19 = vmul.f32 %v2158_v18, %v2156_v16 }
 0x661   :  { %v1382_v20 = vrot.slane %v1380_v19, 5 }
 0x663   :  { %1889 = vmatmul.mubr.msk.f32.vlgmr.msra.gmra.mrb[12].mxu0 %vm263_vm2, %v1382_v20  ;;  %1890 = vmatmul.mubr.msk.f32.vlgmr.msra.gmra.mrb[16].mxu1 %vm263_vm2, %v1382_v20 }
 0x664   :  { %2031 = vmatpush1.bf16.msra.mxu0 %v2371_v8  ;;  %2039 = vmatpush1.bf16.msra.mxu1 %v2391_v25 }
 0x665   :  { %2033 = vmatprep.subr.bf16.mxu0 %v2377_v13  ;;  %2041 = vmatprep.subr.bf16.mxu1 %v2395_v26 }
 0x666   :  { %1638 = vmatprep.mubr.f32.mxu0 %v2292_v0  ;;  %1709 = vmatprep.mubr.f32.mxu1 %v2292_v0 }
 0x668   :  { %2035 = vmatpush1.bf16.msra.mxu0 %v2381_v17  ;;  %2043 = vmatpush1.bf16.msra.mxu1 %v2401_v29 }
 0x669   :  { %2044 = vmatprep.subr.bf16.mxu0 %v2293_v58 }
 0x736   :  { %v1451_v21 = vpop.f32.mrb[12].mxu0  ;;  %v1522_v23 = vpop.f32.mrb[16].mxu1 }
 0x737   :  { %v1531_v24 = vrot.slane %v1451_v21, 2  ;;  %v1453_v27 = vpop.f32.mrb[13].mxu0  ;;  %v1524_v28 = vpop.f32.mrb[17].mxu1  ;;  %v1533_v17 = vrot.slane %v1522_v23, 2 }
 0x738   :  { %v1532_v8 = vrot.slane %v1453_v27, 2  ;;  %v1534_v31 = vrot.slane %v1524_v28, 2 }
 0x739   :  { %v1539_v25 = vadd.f32 %v1531_v24, %v2421_v39  ;;  %v1541_v29 = vadd.f32 %v1533_v17, %v2429_v56 }
 0x73a   :  { %v1540_v13 = vadd.f32 %v1532_v8, %v2423_v41  ;;  %v1542_v32 = vadd.f32 %v1534_v31, %v2427_v53 }
 0x73b   :  { %v1891_v30 = vmul.f32 -1.442695, %v1539_v25 }
 0x73c   :  { %v1892_v26 = vmul.f32 -1.442695, %v1540_v13  ;;  %v1893_v33 = vmul.f32 -1.442695, %v1542_v32  ;;  %v1763_v13 = vld [vmem:[%s2555_s5] sm:$0x1] }
 0x73d   :  { %2159 = vpow2.f32 %v1891_v30 }
 0x73e   :  { %2161 = vpow2.f32 %v1892_v26 }
 0x73f   :  { %2163 = vpow2.f32 %v1893_v33 }
 0x740   :  { %2165 = vtanh.f32 %v1541_v29 }
 0x747   :  { %v2160_v34 = vpop.eup %2159 }
 0x748   :  { %v2162_v35 = vpop.eup %2161  ;;  %v1546_v36 = vadd.f32 1.0, %v2160_v34 }
 0x749   :  { %v1552_v37 = vadd.f32 1.0, %v2162_v35  ;;  %v2164_v38 = vpop.eup %2163 }
 0x74a   :  { %2167 = vrcp.f32 %v1546_v36  ;;  %v2166_v40 = vpop.eup %2165  ;;  %v1559_v46 = vadd.f32 1.0, %v2164_v38 }
 0x74b   :  { %2169 = vrcp.f32 %v1552_v37 }
 0x74c   :  { %2171 = vrcp.f32 %v1559_v46 }
 0x754   :  { %v2168_v42 = vpop.eup %2167 }
 0x755   :  { %v2170_v44 = vpop.eup %2169  ;;  %v1566_v45 = vmul.f32 %v2168_v42, %v2166_v40 }
 0x756   :  { %v1565_v47 = vmul.f32 %v2170_v44, %v1563_v43  ;;  %v2172_v49 = vpop.eup %2171 }
 0x758   :  { %v1567_v48 = vadd.f32 %v1566_v45, %v1565_v47 }
 0x75a   :  { %2173 = vtanh.f32 %v1567_v48  ;;  %v1752_v20 = vrot.slane %v1567_v48, 7 }
 0x764   :  { %v2174_v50 = vpop.eup %2173 }
 0x765   :  { %v1569_v51 = vmul.f32 %v2174_v50, %v2172_v49 }
 0x767   :  { %v1571_v52 = vrot.slane %v1569_v51, 6 }
 0x769   :  { %1894 = vmatmul.mubr.msk.f32.vlgmr.msra.gmra.mrb[14].mxu0 %vm263_vm2, %v1571_v52  ;;  %1895 = vmatmul.mubr.msk.f32.vlgmr.msra.gmra.mrb[18].mxu1 %vm263_vm2, %v1571_v52 }
 0x76a   :  { %1913 = vmatprep.mubr.msk.f32.mxu0 %vm2294_vm3, %v2292_v0  ;;  %2046 = vmatpush3.bf16.msra.mxu0 %v2045_v59 }
 0x76b   :  { %2047 = vmatprep.subr.bf16.mxu0 %v2293_v58 }
 0x76e   :  { %2049 = vmatpush3.bf16.msra.mxu0 %v2048_v61 }
 0x83c   :  { %v1640_v4 = vpop.f32.mrb[14].mxu0  ;;  %v1711_v62 = vpop.f32.mrb[18].mxu1 }
 0x83d   :  { %v1720_v22 = vrot.slane %v1640_v4, 1  ;;  %v1642_v63 = vpop.f32.mrb[15].mxu0  ;;  %v1713_v1 = vpop.f32.mrb[19].mxu1  ;;  %v1722_v10 = vrot.slane %v1711_v62, 1 }
 0x83e   :  { %v1721_v2 = vrot.slane %v1642_v63, 1  ;;  %v1723_v9 = vrot.slane %v1713_v1, 1 }
 0x83f   :  { %v1728_v3 = vadd.f32 %v1720_v22, %v2421_v39  ;;  %v1730_v12 = vadd.f32 %v1722_v10, %v2429_v56 }
 0x840   :  { %v1729_v5 = vadd.f32 %v1721_v2, %v2423_v41  ;;  %v1731_v0 = vadd.f32 %v1723_v9, %v2427_v53 }
 0x841   :  { %v1896_v6 = vmul.f32 -1.442695, %v1728_v3 }
 0x842   :  { %v1897_v7 = vmul.f32 -1.442695, %v1729_v5  ;;  %v1898_v11 = vmul.f32 -1.442695, %v1731_v0 }
 0x843   :  { %2175 = vpow2.f32 %v1896_v6 }
 0x844   :  { %2177 = vpow2.f32 %v1897_v7 }
 0x845   :  { %2179 = vpow2.f32 %v1898_v11 }
 0x846   :  { %2181 = vtanh.f32 %v1730_v12 }
 0x84d   :  { %v2176_v14 = vpop.eup %2175 }
 0x84e   :  { %v2178_v15 = vpop.eup %2177  ;;  %v1735_v16 = vadd.f32 1.0, %v2176_v14 }
 0x84f   :  { %v1741_v18 = vadd.f32 1.0, %v2178_v15  ;;  %v2180_v39 = vpop.eup %2179 }
 0x850   :  { %2183 = vrcp.f32 %v1735_v16  ;;  %v2182_v41 = vpop.eup %2181  ;;  %v1748_v24 = vadd.f32 1.0, %v2180_v39 }
 0x851   :  { %2185 = vrcp.f32 %v1741_v18 }
 0x852   :  { %2187 = vrcp.f32 %v1748_v24 }
 0x85a   :  { %v2184_v19 = vpop.eup %2183 }
 0x85b   :  { %v2186_v21 = vpop.eup %2185  ;;  %v1755_v23 = vmul.f32 %v2184_v19, %v2182_v41 }
 0x85c   :  { %v1754_v53 = vmul.f32 %v2186_v21, %v1752_v20  ;;  %v2188_v56 = vpop.eup %2187 }
 0x85e   :  { %v1756_v27 = vadd.f32 %v1755_v23, %v1754_v53 }
 0x860   :  { %2189 = vtanh.f32 %v1756_v27 }
 0x86a   :  { %v2190_v28 = vpop.eup %2189 }
 0x86b   :  { %v1758_v8 = vmul.f32 %v2190_v28, %v2188_v56 }
 0x86d   :  { %v1765_v25 = vrot.slane %v1758_v8, 7 }
 0x86f   :  { %1914 = vmatmul.mubr.msk.f32.vlgmr.msra.gmra.mrb[16].mxu0 %vm263_vm2, %v1765_v25 }
 0x942   :  { %v1834_v30 = vpop.f32.mrb[16].mxu0 }
 0x943   :  { %v1835_v26 = vadd.f32 %v1834_v30, %v1763_v13  ;;  %v1915_v31 = vpop.f32.mrb[17].mxu0 }
 0x945   :  { %1838 = vst [vmem:[#allocation8] sm:$0x1] %v1835_v26 }
 0x946   :  { %2268 = shalt.err (!%p2265_p0)
}
 0x947   :  { %s2269_s20 = scalar_lea.hbm %s2556_s6, 16 }
 0x948   :  { %p2270_p1 = scmp.ne.s32.totalorder %s2556_s6, %s2269_s20  ;;  %p2273_p2 = scmp.lt.u32.totalorder %s2269_s20, %s2556_s6 }
 0x94a   :  { %p2275_p3 = pnand %p2273_p2, %p2270_p1 }
 0x94c   :  { %2278 = shalt.err (!%p2275_p3)
}
 0x94d   :  { %1848 = dma.vmem_to_hbm [thread:$0]  %s1846_s15, 16, %s2556_s6, [#allocation4]  }
 0x94e   :  { %2283 = dma.done.wait [#allocation4], 16  }
 0x94f   :  { %2284 = vsyncadd [#allocation4], 4294967280 }
 0x950   :  { %1852 = vsyncpa [#allocation3], 1 }
 0x951   :  { %1853 = vsyncpa [#allocation6], 1 }
 0x952   :  { %1854 = vsyncpa [#allocation4], 1 }

</bundles_post_ra>
